<compile_context>
chip_gen: v5e
topology: v5e:2x2
jax: 0.10.0
libtpu: 0.0.40
codegen_flags: <defaults>
</compile_context>

<pallas_src>
import functools
import math

import jax
import jax.numpy as jnp
from jax.experimental import pallas as pl
from jax.experimental.pallas import tpu as pltpu


def _round_up(x, m):
    return ((x + m - 1) // m) * m


def _fold_factor(c_out, max_g=8):
    """Smallest G such that G * c_out is a multiple of 128 (lane-dense output)."""
    if c_out % 128 == 0:
        return 1
    g = 128 // math.gcd(c_out, 128)
    return g if g <= max_g else 1


def timeblock_kernel(x_ref, w_ref, b_ref, o_ref, *, lane_w):
    # Single fused MXU dot for conv1/conv2/conv3 (weights concatenated along N).
    y = jnp.dot(x_ref[...], w_ref[...],
                preferred_element_type=jnp.float32) + b_ref[...]
    y1 = y[:, :lane_w]                 # conv1  (128-aligned lane slices)
    y2 = y[:, lane_w:2 * lane_w]       # conv2
    y3 = y[:, 2 * lane_w:]             # conv3
    o_ref[...] = jnp.maximum(y1 + jax.nn.sigmoid(y2) + y3, 0.0)


def _pack_conv_weight(W):
    # W: (C_out, C_in, 1, K)  ->  (K*C_in, C_out) with row index k*C_in + c
    C_out, C_in, _, K = W.shape
    return jnp.transpose(W[:, :, 0, :], (2, 1, 0)).reshape(K * C_in, C_out)


@functools.partial(jax.jit, static_argnames=("kernel_size", "block_rows"))
def timeblock_forward(X, W1, b1, W2, b2, W3, b3, kernel_size=3,
                      block_rows=1024):
    B, N, T, C_in = X.shape
    K = kernel_size
    T_out = T - K + 1
    C_out = W1.shape[0]
    Kc = K * C_in

    G = _fold_factor(C_out)            # samples folded per kernel row
    lane_w = G * C_out                 # kernel output lane width (mult of 128)

    M = B * N * T_out                  # total im2col sample rows
    Mg = -(-M // G)                    # grouped rows (ceil)
    # Grouped-row tile: multiple of 16 (bf16 sublane packing) and <= block_rows.
    bm = _round_up(min(block_rows, _round_up(Mg, 16)), 16)
    Mg_pad = _round_up(Mg, bm)
    M_pad = Mg_pad * G

    # im2col along the time axis (XLA glue; padded rows are sliced off later).
    # TODO(synk): move the K-tap gather inside the kernel (block X as
    # (rows, T, C_in)) to avoid materializing the K*C_in-wide slab in HBM.
    X_col = jnp.concatenate([X[:, :, k:k + T_out, :] for k in range(K)],
                            axis=-1).reshape(M, Kc)
    X_col = jnp.pad(X_col, ((0, M_pad - M), (0, 0))).astype(jnp.bfloat16)
    Xg = X_col.reshape(Mg_pad, G * Kc)           # fold G samples per row

    # Fused, block-diagonal-folded weights: (G*Kc, 3*G*C_out) in bf16,
    # fused bias (1, 3*G*C_out) in f32.
    eye_g = jnp.eye(G, dtype=jnp.float32)
    W_all = jnp.concatenate(
        [jnp.kron(eye_g, _pack_conv_weight(W)) for W in (W1, W2, W3)],
        axis=1).astype(jnp.bfloat16)
    b_all = jnp.concatenate(
        [jnp.tile(b, G) for b in (b1, b2, b3)]
    ).reshape(1, 3 * lane_w).astype(jnp.float32)

    out = pl.pallas_call(
        functools.partial(timeblock_kernel, lane_w=lane_w),
        out_shape=jax.ShapeDtypeStruct((Mg_pad, lane_w), jnp.float32),
        grid=(Mg_pad // bm,),
        in_specs=[
            pl.BlockSpec((bm, G * Kc), lambda i: (i, 0)),          # folded rows
            pl.BlockSpec((G * Kc, 3 * lane_w), lambda i: (0, 0)),  # fused W
            pl.BlockSpec((1, 3 * lane_w), lambda i: (0, 0)),       # fused bias
        ],
        out_specs=pl.BlockSpec((bm, lane_w), lambda i: (i, 0)),
        compiler_params=pltpu.CompilerParams(
            dimension_semantics=("parallel",),   # shards grid over v7x's 2 TCs
            vmem_limit_bytes=32 * 1024 * 1024),
    )(Xg, W_all, b_all)

    # (Mg_pad, G*C_out) row-major is exactly (Mg_pad*G, C_out): free reshape.
    return out.reshape(M_pad, C_out)[:M].reshape(B, N, T_out, C_out)


def _reference_forward(X, W1, b1, W2, b2, W3, b3, kernel_size=3):
    # Pure-JAX f32 reference matching the PyTorch semantics exactly.
    B, N, T, C_in = X.shape
    K = kernel_size
    T_out = T - K + 1

    def conv(W, b):
        acc = jnp.zeros((B, N, T_out, W.shape[0]), jnp.float32)
        for k in range(K):
            acc = acc + jnp.einsum("bntc,oc->bnto",
                                   X[:, :, k:k + T_out, :], W[:, :, 0, k])
        return acc + b[None, None, None, :]

    y1 = conv(W1, b1)
    y2 = conv(W2, b2)
    y3 = conv(W3, b3)
    return jnp.maximum(y1 + jax.nn.sigmoid(y2) + y3, 0.0)


def init_params(key, in_channels, out_channels, kernel_size=3):
    # Deterministic init mimicking nn.Conv2d default (uniform +/- 1/sqrt(fan_in)).
    fan_in = in_channels * 1 * kernel_size
    bound = 1.0 / (fan_in ** 0.5)
    keys = jax.random.split(key, 6)
    shape_w = (out_channels, in_channels, 1, kernel_size)
    W1 = jax.random.uniform(keys[0], shape_w, jnp.float32, -bound, bound)
    b1 = jax.random.uniform(keys[1], (out_channels,), jnp.float32, -bound, bound)
    W2 = jax.random.uniform(keys[2], shape_w, jnp.float32, -bound, bound)
    b2 = jax.random.uniform(keys[3], (out_channels,), jnp.float32, -bound, bound)
    W3 = jax.random.uniform(keys[4], shape_w, jnp.float32, -bound, bound)
    b3 = jax.random.uniform(keys[5], (out_channels,), jnp.float32, -bound, bound)
    return W1, b1, W2, b2, W3, b3


if __name__ == "__main__":
    key = jax.random.PRNGKey(0)
    k_x, k_p = jax.random.split(key)

    # Small shapes: batch=2, num_nodes=4, num_timesteps=8, in_channels=4.
    B, N, T, C_in, C_out, K = 2, 4, 8, 4, 32, 3
    X = jax.random.normal(k_x, (B, N, T, C_in), jnp.float32)
    params = init_params(k_p, C_in, C_out, K)

    out = timeblock_forward(X, *params, kernel_size=K)
    out = jax.block_until_ready(out)

    ref = _reference_forward(X, *params, kernel_size=K)
    assert out.shape == (B, N, T - K + 1, C_out), out.shape
    # bf16 activations/weights on the MXU -> loosened tolerance vs f32 reference.
    assert jnp.allclose(out, ref, atol=5e-2, rtol=5e-2), \
        float(jnp.max(jnp.abs(out - ref)))

    print("KERNEL_OK")
</pallas_src>

<mosaic_0001>
module attributes {stable_mosaic.version = 11 : i64} {
  func.func @timeblock_kernel(%arg0: i32, %arg1: memref<16x48xbf16, #tpu.memory_space<vmem>>, %arg2: memref<48x384xbf16, #tpu.memory_space<vmem>>, %arg3: memref<1x384xf32, #tpu.memory_space<vmem>>, %arg4: memref<16x128xf32, #tpu.memory_space<vmem>>) attributes {dimension_semantics = [#tpu.dimension_semantics<parallel>], iteration_bounds = array<i64: 1>, scalar_prefetch = 0 : i64, scratch_operands = 0 : i64, tpu.core_type = #tpu.core_type<tc>, window_params = [{transform_indices = @transform_0, window_bounds = array<i64: 16, 48>}, {pipeline_mode = #tpu.pipeline_mode<synchronous>, transform_indices = @transform_1, window_bounds = array<i64: 48, 384>}, {pipeline_mode = #tpu.pipeline_mode<synchronous>, transform_indices = @transform_2, window_bounds = array<i64: 1, 384>}, {transform_indices = @transform_3, window_bounds = array<i64: 16, 128>}]} {
    %c0 = arith.constant 0 : index
    %c0_0 = arith.constant 0 : index
    %0 = vector.load %arg1[%c0, %c0_0] : memref<16x48xbf16, #tpu.memory_space<vmem>>, vector<16x48xbf16>
    %c0_1 = arith.constant 0 : index
    %c0_2 = arith.constant 0 : index
    %1 = vector.load %arg2[%c0_1, %c0_2] : memref<48x384xbf16, #tpu.memory_space<vmem>>, vector<48x384xbf16>
    %cst = arith.constant dense<0.000000e+00> : vector<16x384xf32>
    %2 = tpu.matmul %0, %1, %cst {dimension_numbers = #tpu.dot_dimension_numbers<[1], [0], [0], [1], [0, 0, 1, 1], [], []>} : vector<16x48xbf16>, vector<48x384xbf16>, vector<16x384xf32> -> vector<16x384xf32>
    %c0_3 = arith.constant 0 : index
    %c0_4 = arith.constant 0 : index
    %3 = vector.load %arg3[%c0_3, %c0_4] : memref<1x384xf32, #tpu.memory_space<vmem>>, vector<1x384xf32>
    %4 = vector.broadcast %3 : vector<1x384xf32> to vector<16x384xf32>
    %5 = arith.addf %2, %4 : vector<16x384xf32>
    %6 = vector.extract_strided_slice %5 {offsets = [0, 0], sizes = [16, 128], strides = [1, 1]} : vector<16x384xf32> to vector<16x128xf32>
    %7 = vector.extract_strided_slice %5 {offsets = [0, 128], sizes = [16, 128], strides = [1, 1]} : vector<16x384xf32> to vector<16x128xf32>
    %8 = vector.extract_strided_slice %5 {offsets = [0, 256], sizes = [16, 128], strides = [1, 1]} : vector<16x384xf32> to vector<16x128xf32>
    %9 = arith.negf %7 : vector<16x128xf32>
    %10 = math.exp %9 : vector<16x128xf32>
    %cst_5 = arith.constant 1.000000e+00 : f32
    %11 = vector.broadcast %cst_5 : f32 to vector<16x128xf32>
    %12 = arith.addf %11, %10 : vector<16x128xf32>
    %13 = arith.divf %11, %12 : vector<16x128xf32>
    %14 = arith.addf %6, %13 : vector<16x128xf32>
    %15 = arith.addf %14, %8 : vector<16x128xf32>
    %cst_6 = arith.constant 0.000000e+00 : f32
    %16 = vector.broadcast %cst_6 : f32 to vector<16x128xf32>
    %17 = arith.maximumf %15, %16 : vector<16x128xf32>
    %c0_7 = arith.constant 0 : index
    %c0_8 = arith.constant 0 : index
    %18 = vector.load %arg4[%c0_7, %c0_8] : memref<16x128xf32, #tpu.memory_space<vmem>>, vector<16x128xf32>
    tpu.vector_store %arg4[%c0_7, %c0_8], %17 {strides = array<i32>} : memref<16x128xf32, #tpu.memory_space<vmem>>, vector<16x128xf32>,
    return
  }
  func.func @transform_0(%arg0: i32) -> (i32, i32) {
    %c0_i32 = arith.constant 0 : i32
    %c0_i32_0 = arith.constant 0 : i32
    return %arg0, %c0_i32 : i32, i32
  }
  func.func @transform_1(%arg0: i32) -> (i32, i32) {
    %c0_i32 = arith.constant 0 : i32
    %c0_i32_0 = arith.constant 0 : i32
    %c0_i32_1 = arith.constant 0 : i32
    return %c0_i32, %c0_i32_0 : i32, i32
  }
  func.func @transform_2(%arg0: i32) -> (i32, i32) {
    %c0_i32 = arith.constant 0 : i32
    %c0_i32_0 = arith.constant 0 : i32
    %c0_i32_1 = arith.constant 0 : i32
    return %c0_i32, %c0_i32_0 : i32, i32
  }
  func.func @transform_3(%arg0: i32) -> (i32, i32) {
    %c0_i32 = arith.constant 0 : i32
    %c0_i32_0 = arith.constant 0 : i32
    return %arg0, %c0_i32 : i32, i32
  }
}

</mosaic_0001>

<bundles_post_ra>
// kernel: mul.18
= control target key start
LH: loop header
LB: loop body
LE: loop exit
PB: predicated region body
PF: predicated region fallthrough
CT: control target
= control target key end

     0   :  { %vm15_vm0 = vcmask 261120   ;;  %s59_s0 = inlined_call_operand.vmem [shape: f32[3,4,32], index: 0, kind: input, shape index: {}]   ;;  %s60_s1 = inlined_call_operand.vmem [shape: f32[12,32], index: 1, kind: output, shape index: {}]  }
   0x1   :  { %v27_v0 = vld [vmem:[%s59_s0 + $0x8] sm:$0xf]  ;;  %v28_v1 = vld [vmem:[%s59_s0 + $0x4] sm:$0xf]  ;;  %v12_v2 = vld [vmem:[%s59_s0] sm:$0xf] }
   0x2   :  { %7 = vst [vmem:[#allocation0] sm:$0xf] %v27_v0 }
   0x3   :  { %11 = vst [vmem:[#allocation0 + $0x10] sm:$0xf] %v28_v1 }
   0x4   :  { %13 = vst [vmem:[#allocation0 + $0x8] sm:$0xf] %v12_v2 }
   0x9   :  { %v23_v3 = vld [vmem:[#allocation0] sm:$0xf]  }
   0xa   :  { %v18_v4 = vld [vmem:[#allocation0 + $0x10] sm:$0xf]   ;;  %30 = vst.msk [vmem:[%s60_s1 + $0x8] sm:$0xf] %vm15_vm0, %v23_v3  }
   0xb   :  { %v14_v5 = vld [vmem:[#allocation0 + $0x8] sm:$0xf]   ;;  %29 = vst.msk [vmem:[%s60_s1 + $0x4] sm:$0xf] %vm15_vm0, %v18_v4  }
   0xc   :  { %16 = vst.msk [vmem:[%s60_s1] sm:$0xf] %vm15_vm0, %v14_v5  }

// kernel: tile.18
= control target key start
LH: loop header
LB: loop body
LE: loop exit
PB: predicated region body
PF: predicated region fallthrough
CT: control target
= control target key end

     0   :  { %s22_s0 = inlined_call_operand.vmem [shape: f32[32], index: 0, kind: input, shape index: {}]   ;;  %s23_s1 = inlined_call_operand.vmem [shape: f32[4,32], index: 1, kind: output, shape index: {}]  }
   0x1   :  { %v4_v0 = vld [vmem:[%s22_s0] ss:$0 sm:$0xff] }
   0x2   :  { %5 = vst [vmem:[%s23_s1] sm:$0xf] %v4_v0 }

// kernel: tile.19
= control target key start
LH: loop header
LB: loop body
LE: loop exit
PB: predicated region body
PF: predicated region fallthrough
CT: control target
= control target key end

     0   :  { %s37_s8 = smov 32   ;;  %s38_s9 = smov 64   ;;  %vm7_vm0 = vcmask 261120   ;;  %vm13_vm1 = vcmask 1048320   ;;  %vm19_vm2 = vcmask 785920   ;;  %vm25_vm3 = vcmask 523520   ;;  %s55_s0 = inlined_call_operand.vmem [shape: f32[4,32], index: 0, kind: input, shape index: {}]   ;;  %s56_s1 = inlined_call_operand.vmem [shape: f32[128], index: 1, kind: output, shape index: {}]  }
   0x1   :  { %v4_v0 = vld [vmem:[%s55_s0] sm:$0xf]  ;;  %s36_s0 = smov 96  }
   0x2   :  { %5 = vst [vmem:[#allocation1] sm:$0xf] %v4_v0 }
   0x9   :  { %v10_v1 = vld [vmem:[#allocation1 + $0x3] sm:$0x1]   ;;  %v22_v2 = vld [vmem:[#allocation1 + $0x1] sm:$0x1]   ;;  %v16_v3 = vld [vmem:[#allocation1 + $0x2] sm:$0x1]  }
   0xa   :  { %11 = vrot.lane.b32.xlu0 %v10_v1, %s36_s0  ;;  %23 = vrot.lane.b32.xlu1 %v22_v2, %s37_s8  ;;  %v6_v4 = vld [vmem:[#allocation1] sm:$0x1]  }
   0xb   :  { %8 = vst.msk [vmem:[#allocation0] sm:$0x1] %vm7_vm0, %v6_v4  }
  0x12   :  { %17 = vrot.lane.b32.xlu0 %v16_v3, %s38_s9 }
  0x7c   :  { %v12_v5 = vpop.permute.xlu0 %11   ;;  %v24_v6 = vpop.permute.xlu1 %23  }
  0x7d   :  { %14 = vst.msk [vmem:[#allocation0] sm:$0x1] %vm13_vm1, %v12_v5  }
  0x84   :  { %v18_v7 = vpop.permute.xlu0 %17  }
  0x85   :  { %20 = vst.msk [vmem:[#allocation0] sm:$0x1] %vm19_vm2, %v18_v7  }
  0x86   :  { %26 = vst.msk [vmem:[#allocation0] sm:$0x1] %vm25_vm3, %v24_v6  }
  0x8d   :  { %v29_v8 = vld [vmem:[#allocation0] sm:$0x1] }
  0x8e   :  { %32 = vst [vmem:[%s56_s1] sm:$0x1] %v29_v8 }

// kernel: timeblock_forward.1
= control target key start
LH: loop header
LB: loop body
LE: loop exit
PB: predicated region body
PF: predicated region fallthrough
CT: control target
= control target key end

     0   :  { %vm90_vm0 = vcmask 392192   ;;  %s335_s1 = inlined_call_operand.vmem [shape: bf16[48,384], index: 1, kind: input, shape index: {}]   ;;  %s336_s0 = inlined_call_operand.vmem [shape: bf16[16,48], index: 0, kind: input, shape index: {}]   ;;  %s337_s2 = inlined_call_operand.vmem [shape: f32[1,384], index: 2, kind: input, shape index: {}]   ;;  %s338_s3 = inlined_call_operand.vmem [shape: f32[16,128], index: 3, kind: output, shape index: {}]  }
   0x1   :  { %v238_v0 = vld [vmem:[%s335_s1 + $0x34] sm:$0xf]  ;;  %v218_v1 = vld [vmem:[%s335_s1 + $0x3c] sm:$0xf0]  ;;  %v235_v2 = vld [vmem:[%s335_s1 + $0x1c] sm:$0xf] }
   0x2   :  { %v221_v3 = vor.u32 %v238_v0, %v218_v1  ;;  %v206_v4 = vld [vmem:[%s335_s1 + $0x24] sm:$0xf0]  ;;  %v232_v5 = vld [vmem:[%s335_s1 + $0x4] sm:$0xf]  ;;  %v194_v6 = vld [vmem:[%s335_s1 + $0xc] sm:$0xf0] }
   0x3   :  { %v224_v7 = vld [vmem:[%s335_s1 + $0x38] sm:$0xf]  ;;  %v240_v8 = vld [vmem:[%s335_s1 + $0x40] sm:$0xf0]  ;;  %v209_v9 = vor.u32 %v235_v2, %v206_v4  ;;  %v216_v11 = vld [vmem:[%s335_s1 + $0x30] sm:$0xf]  ;;  %v197_v22 = vor.u32 %v232_v5, %v194_v6 }
   0x4   :  { %113 = vmatpush.bf16.msra.mxu1 %v221_v3  ;;  %v225_v10 = vor.u32 %v240_v8, %v224_v7  ;;  %v239_v12 = vld [vmem:[%s335_s1 + $0x38] sm:$0xf0]  ;;  %v212_v13 = vld [vmem:[%s335_s1 + $0x20] sm:$0xf]  ;;  %v237_v15 = vld [vmem:[%s335_s1 + $0x28] sm:$0xf0] }
   0x5   :  { %v217_v14 = vor.u32 %v239_v12, %v216_v11  ;;  %v204_v16 = vld [vmem:[%s335_s1 + $0x18] sm:$0xf]  ;;  %v236_v17 = vld [vmem:[%s335_s1 + $0x20] sm:$0xf0]  ;;  %v213_v18 = vor.u32 %v237_v15, %v212_v13  ;;  %v200_v20 = vld [vmem:[%s335_s1 + $0x8] sm:$0xf] }
   0x6   :  { %127 = vmatpush.bf16.msra.mxu2 %v225_v10  ;;  %v205_v19 = vor.u32 %v236_v17, %v204_v16  ;;  %v234_v21 = vld [vmem:[%s335_s1 + $0x10] sm:$0xf0]  ;;  %v192_v23 = vld [vmem:[%s335_s1] sm:$0xf]  ;;  %v233_v24 = vld [vmem:[%s335_s1 + $0x8] sm:$0xf0] }
   0x7   :  { %99 = vmatpush.bf16.msra.mxu0 %v217_v14  ;;  %v201_v25 = vor.u32 %v234_v21, %v200_v20  ;;  %v231_v26 = vld [vmem:[%s336_s0] sm:$0xff]  ;;  %v193_v27 = vor.u32 %v233_v24, %v192_v23 }
   0x8   :  { %114 = vmatpush.bf16.msra.mxu1 %v209_v9  ;;  %v29_v28 = vld [vmem:[%s337_s2] sm:$0x7] }
   0x9   :  { %v32_v29 = vperm.slane %v29_v28, 1  ;;  %v31_v42 = vperm.slane %v29_v28, 0  ;;  %v33_v48 = vperm.slane %v29_v28, 2 }
   0xa   :  { %128 = vmatpush.bf16.msra.mxu2 %v213_v18 }
   0xb   :  { %100 = vmatpush.bf16.msra.mxu0 %v205_v19 }
   0xc   :  { %115 = vmatpush.bf16.msra.mxu1 %v197_v22 }
   0xe   :  { %129 = vmatpush.bf16.msra.mxu2 %v201_v25 }
   0xf   :  { %227 = vmatmul.msk.bf16.vlgmr.msra.gmra.mxu1 %vm90_vm0, %v231_v26  ;;  %101 = vmatpush.bf16.msra.mxu0 %v193_v27 }
  0x11   :  { %228 = vmatmul.msk.bf16.vlgmr.msra.gmra.mxu2 %vm90_vm0, %v231_v26 }
  0x12   :  { %226 = vmatmul.msk.bf16.vlgmr.msra.gmra.mxu0 %vm90_vm0, %v231_v26 }
  0x8c   :  { %v117_v30 = vpop.f32.mrf.mxu1 }
  0x8d   :  { %v118_v31 = vadd.f32 %v117_v30, %v32_v29 }
  0x8f   :  { %v229_v32 = vmul.f32 -1.442695, %v118_v31  ;;  %v103_v44 = vpop.f32.mrf.mxu0 }
  0x90   :  { %v104_v50 = vadd.f32 %v103_v44, %v31_v42 }
  0x91   :  { %241 = vpow2.f32 %v229_v32 }
  0x94   :  { %v119_v33 = vpop.f32.mrf.mxu1  ;;  %v131_v49 = vpop.f32.mrf.mxu2 }
  0x95   :  { %v120_v34 = vadd.f32 %v119_v33, %v32_v29  ;;  %v132_v55 = vadd.f32 %v131_v49, %v33_v48 }
  0x97   :  { %v242_v35 = vpop.eup %241  ;;  %v230_v36 = vmul.f32 -1.442695, %v120_v34  ;;  %v105_v0 = vpop.f32.mrf.mxu0 }
  0x98   :  { %v142_v37 = vadd.f32 1.0, %v242_v35  ;;  %v106_v5 = vadd.f32 %v105_v0, %v31_v42 }
  0x99   :  { %243 = vpow2.f32 %v230_v36 }
  0x9a   :  { %245 = vrcp.f32 %v142_v37  ;;  %v155_v45 = vand.u32 2147483648, %v142_v37  ;;  %v153_v47 = vand.u32 2147483647, %v142_v37  ;;  %vm149_vm2 = vweird.f32 %v142_v37 }
  0x9c   :  { %v156_v53 = vor.u32 1.1754944e-38, %v155_v45  ;;  %vm154_vm4 = vcmp.eq.f32.partialorder %v153_v47, 8.507059e+37  ;;  %v133_v4 = vpop.f32.mrf.mxu2 }
  0x9d   :  { %v134_v9 = vadd.f32 %v133_v4, %v33_v48 }
  0x9f   :  { %v244_v38 = vpop.eup %243 }
  0xa0   :  { %v246_v39 = vpop.eup %245  ;;  %v143_v40 = vadd.f32 1.0, %v244_v38 }
  0xa1   :  { %v145_v41 = vmul.f32 %v246_v39, %v142_v37  ;;  %vm150_vm1 = vweird.f32 %v246_v39 }
  0xa2   :  { %247 = vrcp.f32 %v143_v40  ;;  %vm151_vm3 = vmor %vm149_vm2, %vm150_vm1  ;;  %v170_v60 = vand.u32 2147483648, %v143_v40  ;;  %v168_v63 = vand.u32 2147483647, %v143_v40  ;;  %vm164_vm6 = vweird.f32 %v143_v40 }
  0xa3   :  { %v146_v43 = vsub.f32 1.0, %v145_v41 }
  0xa4   :  { %v171_v3 = vor.u32 1.1754944e-38, %v170_v60  ;;  %vm169_vm8 = vcmp.eq.f32.partialorder %v168_v63, 8.507059e+37 }
  0xa5   :  { %v147_v46 = vmul.f32 %v246_v39, %v146_v43 }
  0xa7   :  { %v148_v51 = vadd.f32 %v246_v39, %v147_v46 }
  0xa8   :  { %v248_v52 = vpop.eup %247 }
  0xa9   :  { %v152_v54 = vsel %vm151_vm3, %v246_v39, %v148_v51  ;;  %v160_v56 = vmul.f32 %v248_v52, %v143_v40  ;;  %vm165_vm5 = vweird.f32 %v248_v52 }
  0xaa   :  { %v157_v57 = vsel %vm154_vm4, %v156_v53, %v152_v54  ;;  %vm166_vm7 = vmor %vm164_vm6, %vm165_vm5 }
  0xab   :  { %v174_v58 = vadd.f32 %v157_v57, %v104_v50  ;;  %v161_v59 = vsub.f32 1.0, %v160_v56 }
  0xad   :  { %v176_v61 = vadd.f32 %v174_v58, %v132_v55  ;;  %v162_v62 = vmul.f32 %v248_v52, %v161_v59 }
  0xaf   :  { %v178_v1 = vmax.f32 %v176_v61, 0.0  ;;  %v163_v2 = vadd.f32 %v248_v52, %v162_v62 }
  0xb1   :  { %180 = vst [vmem:[%s338_s3] sm:$0xff] %v178_v1  ;;  %v167_v6 = vsel %vm166_vm7, %v248_v52, %v163_v2 }
  0xb2   :  { %v172_v7 = vsel %vm169_vm8, %v171_v3, %v167_v6 }
  0xb3   :  { %v175_v8 = vadd.f32 %v172_v7, %v106_v5 }
  0xb5   :  { %v177_v10 = vadd.f32 %v175_v8, %v134_v9 }
  0xb7   :  { %v179_v11 = vmax.f32 %v177_v10, 0.0 }
  0xb9   :  { %181 = vst [vmem:[%s338_s3 + $0x8] sm:$0xff] %v179_v11 }

</bundles_post_ra>
